<compile_context>
chip_gen: v6e
topology: v6e:2x2x1
jax: 0.10.0
libtpu: 0.0.40
codegen_flags: <defaults>
</compile_context>

<pallas_src>
import functools

import jax
import jax.numpy as jnp
from jax import lax
from jax.experimental import pallas as pl
from jax.experimental.pallas import tpu as pltpu


def _round_up(x, m):
    return ((x + m - 1) // m) * m


# ----------------------------- Pallas kernel -------------------------------


def encoder_kernel(x_ref,        # [T*B, 2E]  lane-concat of fwd/bwd embeddings per step
                   wih_ref,      # [2E, Gp]   fused input weights  (r_f|r_b|z_f|z_b|n_f|n_b)
                   whh_ref,      # [2H, Gp]   block-diagonal recurrent weights (same layout)
                   bxp_ref,      # [1, Gp]    b_ih (all gates) + b_hh (r,z) folded in
                   bhn_ref,      # [1, 2H]    b_hh for the n gate (must stay inside r*(...))
                   w_heads_ref,  # [2H, Op]   4 heads fused, lane-padded
                   b_heads_ref,  # [1, Op]
                   out_ref,      # [B, Op]
                   xp_ref,       # scratch [T*B, Gp]
                   *, T, B, H):
    # ---- Hoisted fused input projection: one MXU matmul covering both directions and
    # all gates; Gp is a multiple of 128 so the store is lane-dense (unmasked vst).
    xp_ref[...] = (jnp.dot(x_ref[...], wih_ref[...],
                           preferred_element_type=jnp.float32) + bxp_ref[...])

    whh = whh_ref[...]                                  # hoist weight load out of the loop
    bhn = jnp.broadcast_to(bhn_ref[...], (B, 2 * H))    # hoist: one broadcast total

    def cell(xg, h):
        # h = [h_f | h_b] -> single dot with the block-diagonal [2H, Gp] recurrent weight.
        hg = jnp.dot(h, whh, preferred_element_type=jnp.float32)      # [B, Gp]
        # Gate columns: [r_f | r_b | z_f | z_b | n_f | n_b]; one sigmoid over 4H lanes.
        s = jax.nn.sigmoid(xg[:, 0:4 * H] + hg[:, 0:4 * H])
        r = s[:, 0:2 * H]
        z = s[:, 2 * H:4 * H]
        n = jnp.tanh(xg[:, 4 * H:6 * H] + r * (hg[:, 4 * H:6 * H] + bhn))
        return (1.0 - z) * n + z * h

    h = jnp.zeros((B, 2 * H), jnp.float32)

    if T <= 16:
        # Small static T: fully unrolled; both directions advance in the same step.
        for t in range(T):
            h = cell(xp_ref[t * B:(t + 1) * B, :], h)
    else:
        # Larger T: fori_loop keeps live ranges and compile time bounded.
        def body(t, h):
            xg = xp_ref[pl.ds(pl.multiple_of(t * B, 8), B), :]
            return cell(xg, h)
        h = lax.fori_loop(0, T, body, h)

    # ---- Fused heads: single [B, 2H] @ [2H, Op] dot; lane-dense output store.
    out_ref[...] = (jnp.dot(h, w_heads_ref[...], preferred_element_type=jnp.float32)
                    + b_heads_ref[...])


# ------------------------------- wrapper ------------------------------------


def _pack_fused_gru(params, E, H, G_pad):
    """Pack per-direction GRU weights into the fused [r_f|r_b|z_f|z_b|n_f|n_b] layout."""
    def gate(w, g):
        return w[:, g * H:(g + 1) * H]

    wih_f, wih_b = params["wih_f"], params["wih_b"]
    whh_f, whh_b = params["whh_f"], params["whh_b"]
    bih_f, bih_b = params["bih_f"][0], params["bih_b"][0]
    bhh_f, bhh_b = params["bhh_f"][0], params["bhh_b"][0]

    zE = jnp.zeros((E, H), jnp.float32)
    zH = jnp.zeros((H, H), jnp.float32)

    wih = jnp.concatenate([
        jnp.concatenate([gate(wih_f, 0), zE, gate(wih_f, 1), zE, gate(wih_f, 2), zE], axis=1),
        jnp.concatenate([zE, gate(wih_b, 0), zE, gate(wih_b, 1), zE, gate(wih_b, 2)], axis=1),
    ], axis=0)                                                       # [2E, 6H]
    whh = jnp.concatenate([
        jnp.concatenate([gate(whh_f, 0), zH, gate(whh_f, 1), zH, gate(whh_f, 2), zH], axis=1),
        jnp.concatenate([zH, gate(whh_b, 0), zH, gate(whh_b, 1), zH, gate(whh_b, 2)], axis=1),
    ], axis=0)                                                       # [2H, 6H]

    # b_ih (all gates) and b_hh (r,z gates) are purely additive into the sigmoid args:
    # fold them into the hoisted projection bias.
    bxp = jnp.concatenate([
        bih_f[0:H] + bhh_f[0:H], bih_b[0:H] + bhh_b[0:H],
        bih_f[H:2 * H] + bhh_f[H:2 * H], bih_b[H:2 * H] + bhh_b[H:2 * H],
        bih_f[2 * H:3 * H], bih_b[2 * H:3 * H],
    ])[None, :]                                                      # [1, 6H]
    # b_hh(n) sits inside r*(...), so it stays in the recurrence.
    bhn = jnp.concatenate([bhh_f[2 * H:3 * H], bhh_b[2 * H:3 * H]])[None, :]   # [1, 2H]

    G = 6 * H
    if G_pad != G:
        wih = jnp.pad(wih, ((0, 0), (0, G_pad - G)))
        whh = jnp.pad(whh, ((0, 0), (0, G_pad - G)))
        bxp = jnp.pad(bxp, ((0, 0), (0, G_pad - G)))
    return wih, whh, bxp, bhn


def encoder_forward(tokens, params):
    emb = params["embedding"][tokens]            # [B, T, E]  (gather = glue, plain JAX)
    B, T = tokens.shape
    E = emb.shape[-1]
    H = params["whh_f"].shape[0]
    S = params["w_style_mean"].shape[1]
    C = params["w_content_mean"].shape[1]

    G_pad = max(128, _round_up(6 * H, 128))
    B_pad = max(8, _round_up(B, 8))

    # Time-major; lane-concat the forward and time-reversed embeddings so one hoisted
    # matmul produces both directions' projections.  Flatten in the wrapper (free).
    emb_t = jnp.transpose(emb, (1, 0, 2))                    # [T, B, E]
    x_cat = jnp.concatenate([emb_t, emb_t[::-1]], axis=-1)   # [T, B, 2E]
    if B_pad != B:
        x_cat = jnp.pad(x_cat, ((0, 0), (0, B_pad - B), (0, 0)))
    x_flat = x_cat.reshape(T * B_pad, 2 * E)

    wih, whh, bxp, bhn = _pack_fused_gru(params, E, H, G_pad)

    # Fuse the four heads into one weight/bias and pad the output axis to 128 lanes.
    w_heads = jnp.concatenate([params["w_style_mean"], params["w_style_logvar"],
                               params["w_content_mean"], params["w_content_logvar"]], axis=1)
    b_heads = jnp.concatenate([params["b_style_mean"], params["b_style_logvar"],
                               params["b_content_mean"], params["b_content_logvar"]], axis=1)
    O = w_heads.shape[1]                          # 2S + 2C
    O_pad = max(128, _round_up(O, 128))
    if O_pad != O:
        w_heads = jnp.pad(w_heads, ((0, 0), (0, O_pad - O)))
        b_heads = jnp.pad(b_heads, ((0, 0), (0, O_pad - O)))

    # VMEM budget (everything whole-resident) + advisory cost estimate.
    in_bytes = 4 * (x_flat.size + wih.size + whh.size + bxp.size + bhn.size
                    + w_heads.size + b_heads.size)
    out_bytes = 4 * B_pad * O_pad
    scratch_bytes = 4 * T * B_pad * G_pad
    vmem_limit = int(max(4 << 20, 2 * (in_bytes + out_bytes + scratch_bytes)))

    cost = pl.CostEstimate(
        flops=(2 * T * B_pad * (2 * E) * G_pad        # hoisted input projection
               + 2 * T * B_pad * (2 * H) * G_pad      # recurrence
               + 2 * B_pad * (2 * H) * O_pad),        # heads
        transcendentals=T * B_pad * 6 * H,
        bytes_accessed=in_bytes + out_bytes,
    )

    vmem = pl.BlockSpec(memory_space=pltpu.MemorySpace.VMEM)
    kernel = functools.partial(encoder_kernel, T=T, B=B_pad, H=H)

    out = pl.pallas_call(
        kernel,
        out_shape=jax.ShapeDtypeStruct((B_pad, O_pad), jnp.float32),
        in_specs=[vmem] * 7,
        out_specs=vmem,
        scratch_shapes=[pltpu.VMEM((T * B_pad, G_pad), jnp.float32)],
        compiler_params=pltpu.CompilerParams(vmem_limit_bytes=vmem_limit),
        cost_estimate=cost,
    )(x_flat, wih, whh, bxp, bhn, w_heads, b_heads)

    out = out[:B]
    return (out[:, 0:S],
            out[:, S:2 * S],
            out[:, 2 * S:2 * S + C],
            out[:, 2 * S + C:2 * S + 2 * C])


# --------------------------- pure-JAX reference ------------------------------


def encoder_reference(tokens, params):
    emb = params["embedding"][tokens]            # [B, T, E]
    emb_t = jnp.transpose(emb, (1, 0, 2))        # [T, B, E]
    B = tokens.shape[0]
    H = params["whh_f"].shape[0]

    def run(seq, wih, whh, bih, bhh):
        def step(h, x):
            gi = x @ wih + bih[0]
            gh = h @ whh + bhh[0]
            r = jax.nn.sigmoid(gi[:, 0:H] + gh[:, 0:H])
            z = jax.nn.sigmoid(gi[:, H:2 * H] + gh[:, H:2 * H])
            n = jnp.tanh(gi[:, 2 * H:] + r * gh[:, 2 * H:])
            return (1.0 - z) * n + z * h, None
        h, _ = lax.scan(step, jnp.zeros((B, H), jnp.float32), seq)
        return h

    h_fwd = run(emb_t, params["wih_f"], params["whh_f"], params["bih_f"], params["bhh_f"])
    h_bwd = run(emb_t[::-1], params["wih_b"], params["whh_b"], params["bih_b"], params["bhh_b"])
    h_cat = jnp.concatenate([h_fwd, h_bwd], axis=1)

    def head(w, b):
        return h_cat @ w + b[0]

    return (head(params["w_style_mean"], params["b_style_mean"]),
            head(params["w_style_logvar"], params["b_style_logvar"]),
            head(params["w_content_mean"], params["b_content_mean"]),
            head(params["w_content_logvar"], params["b_content_logvar"]))


# ------------------------------- params -------------------------------------


def init_params(key, vocab_size, embed_dim, hidden_dim, style_dim, content_dim):
    ks = jax.random.split(key, 32)
    k = iter(ks)
    bound = 1.0 / jnp.sqrt(hidden_dim)

    def u(rng, shape):
        return jax.random.uniform(rng, shape, jnp.float32, -bound, bound)

    return {
        "embedding": jax.random.normal(next(k), (vocab_size, embed_dim), jnp.float32),
        # GRU weights, gate order r|z|n packed along the last dim ([in, 3H]).
        "wih_f": u(next(k), (embed_dim, 3 * hidden_dim)),
        "whh_f": u(next(k), (hidden_dim, 3 * hidden_dim)),
        "bih_f": u(next(k), (1, 3 * hidden_dim)),
        "bhh_f": u(next(k), (1, 3 * hidden_dim)),
        "wih_b": u(next(k), (embed_dim, 3 * hidden_dim)),
        "whh_b": u(next(k), (hidden_dim, 3 * hidden_dim)),
        "bih_b": u(next(k), (1, 3 * hidden_dim)),
        "bhh_b": u(next(k), (1, 3 * hidden_dim)),
        # heads: [2H, out]
        "w_style_mean": u(next(k), (2 * hidden_dim, style_dim)),
        "b_style_mean": u(next(k), (1, style_dim)),
        "w_style_logvar": u(next(k), (2 * hidden_dim, style_dim)),
        "b_style_logvar": u(next(k), (1, style_dim)),
        "w_content_mean": u(next(k), (2 * hidden_dim, content_dim)),
        "b_content_mean": u(next(k), (1, content_dim)),
        "w_content_logvar": u(next(k), (2 * hidden_dim, content_dim)),
        "b_content_logvar": u(next(k), (1, content_dim)),
    }


# --------------------------------- main --------------------------------------

if __name__ == "__main__":
    VOCAB, E, H, S, C = 50, 16, 32, 8, 8
    B, T = 2, 8

    key = jax.random.PRNGKey(0)
    k_tok, k_param = jax.random.split(key)
    tokens = jax.random.randint(k_tok, (B, T), 0, VOCAB, dtype=jnp.int32)
    params = init_params(k_param, VOCAB, E, H, S, C)

    fwd = jax.jit(encoder_forward)
    outs = jax.block_until_ready(fwd(tokens, params))
    refs = jax.block_until_ready(encoder_reference(tokens, params))

    for o, r in zip(outs, refs):
        assert o.shape == r.shape and o.dtype == jnp.float32
        assert jnp.allclose(o, r, atol=2e-3, rtol=2e-3), (o, r)

    print("KERNEL_OK")
</pallas_src>

<mosaic_0001>
module attributes {stable_mosaic.version = 11 : i64} {
  func.func @encoder_kernel(%arg0: memref<64x32xf32, #tpu.memory_space<vmem>>, %arg1: memref<32x256xf32, #tpu.memory_space<vmem>>, %arg2: memref<64x256xf32, #tpu.memory_space<vmem>>, %arg3: memref<1x256xf32, #tpu.memory_space<vmem>>, %arg4: memref<1x64xf32, #tpu.memory_space<vmem>>, %arg5: memref<64x128xf32, #tpu.memory_space<vmem>>, %arg6: memref<1x128xf32, #tpu.memory_space<vmem>>, %arg7: memref<8x128xf32, #tpu.memory_space<vmem>>, %arg8: memref<64x256xf32, #tpu.memory_space<vmem>>) attributes {dimension_semantics = [], scalar_prefetch = 0 : i64, scratch_operands = 1 : i64, tpu.core_type = #tpu.core_type<tc>} {
    %c0 = arith.constant 0 : index
    %c0_0 = arith.constant 0 : index
    %0 = vector.load %arg0[%c0, %c0_0] : memref<64x32xf32, #tpu.memory_space<vmem>>, vector<64x32xf32>
    %c0_1 = arith.constant 0 : index
    %c0_2 = arith.constant 0 : index
    %1 = vector.load %arg1[%c0_1, %c0_2] : memref<32x256xf32, #tpu.memory_space<vmem>>, vector<32x256xf32>
    %cst = arith.constant dense<0.000000e+00> : vector<64x256xf32>
    %2 = tpu.matmul %0, %1, %cst {dimension_numbers = #tpu.dot_dimension_numbers<[1], [0], [0], [1], [0, 0, 1, 1], [], []>} : vector<64x32xf32>, vector<32x256xf32>, vector<64x256xf32> -> vector<64x256xf32>
    %c0_3 = arith.constant 0 : index
    %c0_4 = arith.constant 0 : index
    %3 = vector.load %arg3[%c0_3, %c0_4] : memref<1x256xf32, #tpu.memory_space<vmem>>, vector<1x256xf32>
    %4 = vector.broadcast %3 : vector<1x256xf32> to vector<64x256xf32>
    %5 = arith.addf %2, %4 : vector<64x256xf32>
    %c0_5 = arith.constant 0 : index
    %c0_6 = arith.constant 0 : index
    %6 = vector.load %arg8[%c0_5, %c0_6] : memref<64x256xf32, #tpu.memory_space<vmem>>, vector<64x256xf32>
    tpu.vector_store %arg8[%c0_5, %c0_6], %5 {strides = array<i32>} : memref<64x256xf32, #tpu.memory_space<vmem>>, vector<64x256xf32>,
    %c0_7 = arith.constant 0 : index
    %c0_8 = arith.constant 0 : index
    %7 = vector.load %arg2[%c0_7, %c0_8] : memref<64x256xf32, #tpu.memory_space<vmem>>, vector<64x256xf32>
    %c0_9 = arith.constant 0 : index
    %c0_10 = arith.constant 0 : index
    %8 = vector.load %arg4[%c0_9, %c0_10] : memref<1x64xf32, #tpu.memory_space<vmem>>, vector<1x64xf32>
    %9 = vector.shape_cast %8 : vector<1x64xf32> to vector<1x64xf32>
    %10 = vector.broadcast %9 : vector<1x64xf32> to vector<8x64xf32>
    %cst_11 = arith.constant 0.000000e+00 : f32
    %11 = vector.broadcast %cst_11 : f32 to vector<8x64xf32>
    %c0_12 = arith.constant 0 : index
    %c0_13 = arith.constant 0 : index
    %12 = vector.load %arg8[%c0_12, %c0_13] : memref<64x256xf32, #tpu.memory_space<vmem>>, vector<8x256xf32>
    %cst_14 = arith.constant dense<0.000000e+00> : vector<8x256xf32>
    %13 = tpu.matmul %11, %7, %cst_14 {dimension_numbers = #tpu.dot_dimension_numbers<[1], [0], [0], [1], [0, 0, 1, 1], [], []>} : vector<8x64xf32>, vector<64x256xf32>, vector<8x256xf32> -> vector<8x256xf32>
    %14 = vector.extract_strided_slice %12 {offsets = [0, 0], sizes = [8, 128], strides = [1, 1]} : vector<8x256xf32> to vector<8x128xf32>
    %15 = vector.extract_strided_slice %13 {offsets = [0, 0], sizes = [8, 128], strides = [1, 1]} : vector<8x256xf32> to vector<8x128xf32>
    %16 = arith.addf %14, %15 : vector<8x128xf32>
    %17 = arith.negf %16 : vector<8x128xf32>
    %18 = math.exp %17 : vector<8x128xf32>
    %cst_15 = arith.constant 1.000000e+00 : f32
    %19 = vector.broadcast %cst_15 : f32 to vector<8x128xf32>
    %20 = arith.addf %19, %18 : vector<8x128xf32>
    %21 = arith.divf %19, %20 : vector<8x128xf32>
    %22 = vector.extract_strided_slice %21 {offsets = [0, 0], sizes = [8, 64], strides = [1, 1]} : vector<8x128xf32> to vector<8x64xf32>
    %23 = vector.extract_strided_slice %21 {offsets = [0, 64], sizes = [8, 64], strides = [1, 1]} : vector<8x128xf32> to vector<8x64xf32>
    %24 = vector.extract_strided_slice %12 {offsets = [0, 128], sizes = [8, 64], strides = [1, 1]} : vector<8x256xf32> to vector<8x64xf32>
    %25 = vector.extract_strided_slice %13 {offsets = [0, 128], sizes = [8, 64], strides = [1, 1]} : vector<8x256xf32> to vector<8x64xf32>
    %26 = arith.addf %25, %10 : vector<8x64xf32>
    %27 = arith.mulf %22, %26 : vector<8x64xf32>
    %28 = arith.addf %24, %27 : vector<8x64xf32>
    %29 = math.tanh %28 : vector<8x64xf32>
    %cst_16 = arith.constant 1.000000e+00 : f32
    %30 = vector.broadcast %cst_16 : f32 to vector<8x64xf32>
    %31 = arith.subf %30, %23 : vector<8x64xf32>
    %32 = arith.mulf %31, %29 : vector<8x64xf32>
    %33 = arith.mulf %23, %11 : vector<8x64xf32>
    %34 = arith.addf %32, %33 : vector<8x64xf32>
    %c8 = arith.constant 8 : index
    %c0_17 = arith.constant 0 : index
    %35 = vector.load %arg8[%c8, %c0_17] : memref<64x256xf32, #tpu.memory_space<vmem>>, vector<8x256xf32>
    %cst_18 = arith.constant dense<0.000000e+00> : vector<8x256xf32>
    %36 = tpu.matmul %34, %7, %cst_18 {dimension_numbers = #tpu.dot_dimension_numbers<[1], [0], [0], [1], [0, 0, 1, 1], [], []>} : vector<8x64xf32>, vector<64x256xf32>, vector<8x256xf32> -> vector<8x256xf32>
    %37 = vector.extract_strided_slice %35 {offsets = [0, 0], sizes = [8, 128], strides = [1, 1]} : vector<8x256xf32> to vector<8x128xf32>
    %38 = vector.extract_strided_slice %36 {offsets = [0, 0], sizes = [8, 128], strides = [1, 1]} : vector<8x256xf32> to vector<8x128xf32>
    %39 = arith.addf %37, %38 : vector<8x128xf32>
    %40 = arith.negf %39 : vector<8x128xf32>
    %41 = math.exp %40 : vector<8x128xf32>
    %cst_19 = arith.constant 1.000000e+00 : f32
    %42 = vector.broadcast %cst_19 : f32 to vector<8x128xf32>
    %43 = arith.addf %42, %41 : vector<8x128xf32>
    %44 = arith.divf %42, %43 : vector<8x128xf32>
    %45 = vector.extract_strided_slice %44 {offsets = [0, 0], sizes = [8, 64], strides = [1, 1]} : vector<8x128xf32> to vector<8x64xf32>
    %46 = vector.extract_strided_slice %44 {offsets = [0, 64], sizes = [8, 64], strides = [1, 1]} : vector<8x128xf32> to vector<8x64xf32>
    %47 = vector.extract_strided_slice %35 {offsets = [0, 128], sizes = [8, 64], strides = [1, 1]} : vector<8x256xf32> to vector<8x64xf32>
    %48 = vector.extract_strided_slice %36 {offsets = [0, 128], sizes = [8, 64], strides = [1, 1]} : vector<8x256xf32> to vector<8x64xf32>
    %49 = arith.addf %48, %10 : vector<8x64xf32>
    %50 = arith.mulf %45, %49 : vector<8x64xf32>
    %51 = arith.addf %47, %50 : vector<8x64xf32>
    %52 = math.tanh %51 : vector<8x64xf32>
    %cst_20 = arith.constant 1.000000e+00 : f32
    %53 = vector.broadcast %cst_20 : f32 to vector<8x64xf32>
    %54 = arith.subf %53, %46 : vector<8x64xf32>
    %55 = arith.mulf %54, %52 : vector<8x64xf32>
    %56 = arith.mulf %46, %34 : vector<8x64xf32>
    %57 = arith.addf %55, %56 : vector<8x64xf32>
    %c16 = arith.constant 16 : index
    %c0_21 = arith.constant 0 : index
    %58 = vector.load %arg8[%c16, %c0_21] : memref<64x256xf32, #tpu.memory_space<vmem>>, vector<8x256xf32>
    %cst_22 = arith.constant dense<0.000000e+00> : vector<8x256xf32>
    %59 = tpu.matmul %57, %7, %cst_22 {dimension_numbers = #tpu.dot_dimension_numbers<[1], [0], [0], [1], [0, 0, 1, 1], [], []>} : vector<8x64xf32>, vector<64x256xf32>, vector<8x256xf32> -> vector<8x256xf32>
    %60 = vector.extract_strided_slice %58 {offsets = [0, 0], sizes = [8, 128], strides = [1, 1]} : vector<8x256xf32> to vector<8x128xf32>
    %61 = vector.extract_strided_slice %59 {offsets = [0, 0], sizes = [8, 128], strides = [1, 1]} : vector<8x256xf32> to vector<8x128xf32>
    %62 = arith.addf %60, %61 : vector<8x128xf32>
    %63 = arith.negf %62 : vector<8x128xf32>
    %64 = math.exp %63 : vector<8x128xf32>
    %cst_23 = arith.constant 1.000000e+00 : f32
    %65 = vector.broadcast %cst_23 : f32 to vector<8x128xf32>
    %66 = arith.addf %65, %64 : vector<8x128xf32>
    %67 = arith.divf %65, %66 : vector<8x128xf32>
    %68 = vector.extract_strided_slice %67 {offsets = [0, 0], sizes = [8, 64], strides = [1, 1]} : vector<8x128xf32> to vector<8x64xf32>
    %69 = vector.extract_strided_slice %67 {offsets = [0, 64], sizes = [8, 64], strides = [1, 1]} : vector<8x128xf32> to vector<8x64xf32>
    %70 = vector.extract_strided_slice %58 {offsets = [0, 128], sizes = [8, 64], strides = [1, 1]} : vector<8x256xf32> to vector<8x64xf32>
    %71 = vector.extract_strided_slice %59 {offsets = [0, 128], sizes = [8, 64], strides = [1, 1]} : vector<8x256xf32> to vector<8x64xf32>
    %72 = arith.addf %71, %10 : vector<8x64xf32>
    %73 = arith.mulf %68, %72 : vector<8x64xf32>
    %74 = arith.addf %70, %73 : vector<8x64xf32>
    %75 = math.tanh %74 : vector<8x64xf32>
    %cst_24 = arith.constant 1.000000e+00 : f32
    %76 = vector.broadcast %cst_24 : f32 to vector<8x64xf32>
    %77 = arith.subf %76, %69 : vector<8x64xf32>
    %78 = arith.mulf %77, %75 : vector<8x64xf32>
    %79 = arith.mulf %69, %57 : vector<8x64xf32>
    %80 = arith.addf %78, %79 : vector<8x64xf32>
    %c24 = arith.constant 24 : index
    %c0_25 = arith.constant 0 : index
    %81 = vector.load %arg8[%c24, %c0_25] : memref<64x256xf32, #tpu.memory_space<vmem>>, vector<8x256xf32>
    %cst_26 = arith.constant dense<0.000000e+00> : vector<8x256xf32>
    %82 = tpu.matmul %80, %7, %cst_26 {dimension_numbers = #tpu.dot_dimension_numbers<[1], [0], [0], [1], [0, 0, 1, 1], [], []>} : vector<8x64xf32>, vector<64x256xf32>, vector<8x256xf32> -> vector<8x256xf32>
    %83 = vector.extract_strided_slice %81 {offsets = [0, 0], sizes = [8, 128], strides = [1, 1]} : vector<8x256xf32> to vector<8x128xf32>
    %84 = vector.extract_strided_slice %82 {offsets = [0, 0], sizes = [8, 128], strides = [1, 1]} : vector<8x256xf32> to vector<8x128xf32>
    %85 = arith.addf %83, %84 : vector<8x128xf32>
    %86 = arith.negf %85 : vector<8x128xf32>
    %87 = math.exp %86 : vector<8x128xf32>
    %cst_27 = arith.constant 1.000000e+00 : f32
    %88 = vector.broadcast %cst_27 : f32 to vector<8x128xf32>
    %89 = arith.addf %88, %87 : vector<8x128xf32>
    %90 = arith.divf %88, %89 : vector<8x128xf32>
    %91 = vector.extract_strided_slice %90 {offsets = [0, 0], sizes = [8, 64], strides = [1, 1]} : vector<8x128xf32> to vector<8x64xf32>
    %92 = vector.extract_strided_slice %90 {offsets = [0, 64], sizes = [8, 64], strides = [1, 1]} : vector<8x128xf32> to vector<8x64xf32>
    %93 = vector.extract_strided_slice %81 {offsets = [0, 128], sizes = [8, 64], strides = [1, 1]} : vector<8x256xf32> to vector<8x64xf32>
    %94 = vector.extract_strided_slice %82 {offsets = [0, 128], sizes = [8, 64], strides = [1, 1]} : vector<8x256xf32> to vector<8x64xf32>
    %95 = arith.addf %94, %10 : vector<8x64xf32>
    %96 = arith.mulf %91, %95 : vector<8x64xf32>
    %97 = arith.addf %93, %96 : vector<8x64xf32>
    %98 = math.tanh %97 : vector<8x64xf32>
    %cst_28 = arith.constant 1.000000e+00 : f32
    %99 = vector.broadcast %cst_28 : f32 to vector<8x64xf32>
    %100 = arith.subf %99, %92 : vector<8x64xf32>
    %101 = arith.mulf %100, %98 : vector<8x64xf32>
    %102 = arith.mulf %92, %80 : vector<8x64xf32>
    %103 = arith.addf %101, %102 : vector<8x64xf32>
    %c32 = arith.constant 32 : index
    %c0_29 = arith.constant 0 : index
    %104 = vector.load %arg8[%c32, %c0_29] : memref<64x256xf32, #tpu.memory_space<vmem>>, vector<8x256xf32>
    %cst_30 = arith.constant dense<0.000000e+00> : vector<8x256xf32>
    %105 = tpu.matmul %103, %7, %cst_30 {dimension_numbers = #tpu.dot_dimension_numbers<[1], [0], [0], [1], [0, 0, 1, 1], [], []>} : vector<8x64xf32>, vector<64x256xf32>, vector<8x256xf32> -> vector<8x256xf32>
    %106 = vector.extract_strided_slice %104 {offsets = [0, 0], sizes = [8, 128], strides = [1, 1]} : vector<8x256xf32> to vector<8x128xf32>
    %107 = vector.extract_strided_slice %105 {offsets = [0, 0], sizes = [8, 128], strides = [1, 1]} : vector<8x256xf32> to vector<8x128xf32>
    %108 = arith.addf %106, %107 : vector<8x128xf32>
    %109 = arith.negf %108 : vector<8x128xf32>
    %110 = math.exp %109 : vector<8x128xf32>
    %cst_31 = arith.constant 1.000000e+00 : f32
    %111 = vector.broadcast %cst_31 : f32 to vector<8x128xf32>
    %112 = arith.addf %111, %110 : vector<8x128xf32>
    %113 = arith.divf %111, %112 : vector<8x128xf32>
    %114 = vector.extract_strided_slice %113 {offsets = [0, 0], sizes = [8, 64], strides = [1, 1]} : vector<8x128xf32> to vector<8x64xf32>
    %115 = vector.extract_strided_slice %113 {offsets = [0, 64], sizes = [8, 64], strides = [1, 1]} : vector<8x128xf32> to vector<8x64xf32>
    %116 = vector.extract_strided_slice %104 {offsets = [0, 128], sizes = [8, 64], strides = [1, 1]} : vector<8x256xf32> to vector<8x64xf32>
    %117 = vector.extract_strided_slice %105 {offsets = [0, 128], sizes = [8, 64], strides = [1, 1]} : vector<8x256xf32> to vector<8x64xf32>
    %118 = arith.addf %117, %10 : vector<8x64xf32>
    %119 = arith.mulf %114, %118 : vector<8x64xf32>
    %120 = arith.addf %116, %119 : vector<8x64xf32>
    %121 = math.tanh %120 : vector<8x64xf32>
    %cst_32 = arith.constant 1.000000e+00 : f32
    %122 = vector.broadcast %cst_32 : f32 to vector<8x64xf32>
    %123 = arith.subf %122, %115 : vector<8x64xf32>
    %124 = arith.mulf %123, %121 : vector<8x64xf32>
    %125 = arith.mulf %115, %103 : vector<8x64xf32>
    %126 = arith.addf %124, %125 : vector<8x64xf32>
    %c40 = arith.constant 40 : index
    %c0_33 = arith.constant 0 : index
    %127 = vector.load %arg8[%c40, %c0_33] : memref<64x256xf32, #tpu.memory_space<vmem>>, vector<8x256xf32>
    %cst_34 = arith.constant dense<0.000000e+00> : vector<8x256xf32>
    %128 = tpu.matmul %126, %7, %cst_34 {dimension_numbers = #tpu.dot_dimension_numbers<[1], [0], [0], [1], [0, 0, 1, 1], [], []>} : vector<8x64xf32>, vector<64x256xf32>, vector<8x256xf32> -> vector<8x256xf32>
    %129 = vector.extract_strided_slice %127 {offsets = [0, 0], sizes = [8, 128], strides = [1, 1]} : vector<8x256xf32> to vector<8x128xf32>
    %130 = vector.extract_strided_slice %128 {offsets = [0, 0], sizes = [8, 128], strides = [1, 1]} : vector<8x256xf32> to vector<8x128xf32>
    %131 = arith.addf %129, %130 : vector<8x128xf32>
    %132 = arith.negf %131 : vector<8x128xf32>
    %133 = math.exp %132 : vector<8x128xf32>
    %cst_35 = arith.constant 1.000000e+00 : f32
    %134 = vector.broadcast %cst_35 : f32 to vector<8x128xf32>
    %135 = arith.addf %134, %133 : vector<8x128xf32>
    %136 = arith.divf %134, %135 : vector<8x128xf32>
    %137 = vector.extract_strided_slice %136 {offsets = [0, 0], sizes = [8, 64], strides = [1, 1]} : vector<8x128xf32> to vector<8x64xf32>
    %138 = vector.extract_strided_slice %136 {offsets = [0, 64], sizes = [8, 64], strides = [1, 1]} : vector<8x128xf32> to vector<8x64xf32>
    %139 = vector.extract_strided_slice %127 {offsets = [0, 128], sizes = [8, 64], strides = [1, 1]} : vector<8x256xf32> to vector<8x64xf32>
    %140 = vector.extract_strided_slice %128 {offsets = [0, 128], sizes = [8, 64], strides = [1, 1]} : vector<8x256xf32> to vector<8x64xf32>
    %141 = arith.addf %140, %10 : vector<8x64xf32>
    %142 = arith.mulf %137, %141 : vector<8x64xf32>
    %143 = arith.addf %139, %142 : vector<8x64xf32>
    %144 = math.tanh %143 : vector<8x64xf32>
    %cst_36 = arith.constant 1.000000e+00 : f32
    %145 = vector.broadcast %cst_36 : f32 to vector<8x64xf32>
    %146 = arith.subf %145, %138 : vector<8x64xf32>
    %147 = arith.mulf %146, %144 : vector<8x64xf32>
    %148 = arith.mulf %138, %126 : vector<8x64xf32>
    %149 = arith.addf %147, %148 : vector<8x64xf32>
    %c48 = arith.constant 48 : index
    %c0_37 = arith.constant 0 : index
    %150 = vector.load %arg8[%c48, %c0_37] : memref<64x256xf32, #tpu.memory_space<vmem>>, vector<8x256xf32>
    %cst_38 = arith.constant dense<0.000000e+00> : vector<8x256xf32>
    %151 = tpu.matmul %149, %7, %cst_38 {dimension_numbers = #tpu.dot_dimension_numbers<[1], [0], [0], [1], [0, 0, 1, 1], [], []>} : vector<8x64xf32>, vector<64x256xf32>, vector<8x256xf32> -> vector<8x256xf32>
    %152 = vector.extract_strided_slice %150 {offsets = [0, 0], sizes = [8, 128], strides = [1, 1]} : vector<8x256xf32> to vector<8x128xf32>
    %153 = vector.extract_strided_slice %151 {offsets = [0, 0], sizes = [8, 128], strides = [1, 1]} : vector<8x256xf32> to vector<8x128xf32>
    %154 = arith.addf %152, %153 : vector<8x128xf32>
    %155 = arith.negf %154 : vector<8x128xf32>
    %156 = math.exp %155 : vector<8x128xf32>
    %cst_39 = arith.constant 1.000000e+00 : f32
    %157 = vector.broadcast %cst_39 : f32 to vector<8x128xf32>
    %158 = arith.addf %157, %156 : vector<8x128xf32>
    %159 = arith.divf %157, %158 : vector<8x128xf32>
    %160 = vector.extract_strided_slice %159 {offsets = [0, 0], sizes = [8, 64], strides = [1, 1]} : vector<8x128xf32> to vector<8x64xf32>
    %161 = vector.extract_strided_slice %159 {offsets = [0, 64], sizes = [8, 64], strides = [1, 1]} : vector<8x128xf32> to vector<8x64xf32>
    %162 = vector.extract_strided_slice %150 {offsets = [0, 128], sizes = [8, 64], strides = [1, 1]} : vector<8x256xf32> to vector<8x64xf32>
    %163 = vector.extract_strided_slice %151 {offsets = [0, 128], sizes = [8, 64], strides = [1, 1]} : vector<8x256xf32> to vector<8x64xf32>
    %164 = arith.addf %163, %10 : vector<8x64xf32>
    %165 = arith.mulf %160, %164 : vector<8x64xf32>
    %166 = arith.addf %162, %165 : vector<8x64xf32>
    %167 = math.tanh %166 : vector<8x64xf32>
    %cst_40 = arith.constant 1.000000e+00 : f32
    %168 = vector.broadcast %cst_40 : f32 to vector<8x64xf32>
    %169 = arith.subf %168, %161 : vector<8x64xf32>
    %170 = arith.mulf %169, %167 : vector<8x64xf32>
    %171 = arith.mulf %161, %149 : vector<8x64xf32>
    %172 = arith.addf %170, %171 : vector<8x64xf32>
    %c56 = arith.constant 56 : index
    %c0_41 = arith.constant 0 : index
    %173 = vector.load %arg8[%c56, %c0_41] : memref<64x256xf32, #tpu.memory_space<vmem>>, vector<8x256xf32>
    %cst_42 = arith.constant dense<0.000000e+00> : vector<8x256xf32>
    %174 = tpu.matmul %172, %7, %cst_42 {dimension_numbers = #tpu.dot_dimension_numbers<[1], [0], [0], [1], [0, 0, 1, 1], [], []>} : vector<8x64xf32>, vector<64x256xf32>, vector<8x256xf32> -> vector<8x256xf32>
    %175 = vector.extract_strided_slice %173 {offsets = [0, 0], sizes = [8, 128], strides = [1, 1]} : vector<8x256xf32> to vector<8x128xf32>
    %176 = vector.extract_strided_slice %174 {offsets = [0, 0], sizes = [8, 128], strides = [1, 1]} : vector<8x256xf32> to vector<8x128xf32>
    %177 = arith.addf %175, %176 : vector<8x128xf32>
    %178 = arith.negf %177 : vector<8x128xf32>
    %179 = math.exp %178 : vector<8x128xf32>
    %cst_43 = arith.constant 1.000000e+00 : f32
    %180 = vector.broadcast %cst_43 : f32 to vector<8x128xf32>
    %181 = arith.addf %180, %179 : vector<8x128xf32>
    %182 = arith.divf %180, %181 : vector<8x128xf32>
    %183 = vector.extract_strided_slice %182 {offsets = [0, 0], sizes = [8, 64], strides = [1, 1]} : vector<8x128xf32> to vector<8x64xf32>
    %184 = vector.extract_strided_slice %182 {offsets = [0, 64], sizes = [8, 64], strides = [1, 1]} : vector<8x128xf32> to vector<8x64xf32>
    %185 = vector.extract_strided_slice %173 {offsets = [0, 128], sizes = [8, 64], strides = [1, 1]} : vector<8x256xf32> to vector<8x64xf32>
    %186 = vector.extract_strided_slice %174 {offsets = [0, 128], sizes = [8, 64], strides = [1, 1]} : vector<8x256xf32> to vector<8x64xf32>
    %187 = arith.addf %186, %10 : vector<8x64xf32>
    %188 = arith.mulf %183, %187 : vector<8x64xf32>
    %189 = arith.addf %185, %188 : vector<8x64xf32>
    %190 = math.tanh %189 : vector<8x64xf32>
    %cst_44 = arith.constant 1.000000e+00 : f32
    %191 = vector.broadcast %cst_44 : f32 to vector<8x64xf32>
    %192 = arith.subf %191, %184 : vector<8x64xf32>
    %193 = arith.mulf %192, %190 : vector<8x64xf32>
    %194 = arith.mulf %184, %172 : vector<8x64xf32>
    %195 = arith.addf %193, %194 : vector<8x64xf32>
    %c0_45 = arith.constant 0 : index
    %c0_46 = arith.constant 0 : index
    %196 = vector.load %arg5[%c0_45, %c0_46] : memref<64x128xf32, #tpu.memory_space<vmem>>, vector<64x128xf32>
    %cst_47 = arith.constant dense<0.000000e+00> : vector<8x128xf32>
    %197 = tpu.matmul %195, %196, %cst_47 {dimension_numbers = #tpu.dot_dimension_numbers<[1], [0], [0], [1], [0, 0, 1, 1], [], []>} : vector<8x64xf32>, vector<64x128xf32>, vector<8x128xf32> -> vector<8x128xf32>
    %c0_48 = arith.constant 0 : index
    %c0_49 = arith.constant 0 : index
    %198 = vector.load %arg6[%c0_48, %c0_49] : memref<1x128xf32, #tpu.memory_space<vmem>>, vector<1x128xf32>
    %199 = vector.broadcast %198 : vector<1x128xf32> to vector<8x128xf32>
    %200 = arith.addf %197, %199 : vector<8x128xf32>
    %c0_50 = arith.constant 0 : index
    %c0_51 = arith.constant 0 : index
    %201 = vector.load %arg7[%c0_50, %c0_51] : memref<8x128xf32, #tpu.memory_space<vmem>>, vector<8x128xf32>
    tpu.vector_store %arg7[%c0_50, %c0_51], %200 {strides = array<i32>} : memref<8x128xf32, #tpu.memory_space<vmem>>, vector<8x128xf32>,
    return
  }
}

</mosaic_0001>

<bundles_post_ra>
// kernel: encoder_forward.1
= control target key start
LH: loop header
LB: loop body
LE: loop exit
PB: predicated region body
PF: predicated region fallthrough
CT: control target
= control target key end

     0   :  { %v1206_v3 = vmov 0.0   ;;  %vm54_vm0 = vcmask 261120   ;;  %v44_v26 = vlaneseq  ;;  %vm233_vm1 = vcmask 523264   ;;  %s1653_s2 = inlined_call_operand.vmem [shape: f32[64,256], index: 2, kind: input, shape index: {}]   ;;  %s1654_s1 = inlined_call_operand.vmem [shape: f32[32,256], index: 1, kind: input, shape index: {}]   ;;  %s1655_s0 = inlined_call_operand.vmem [shape: f32[64,32], index: 0, kind: input, shape index: {}]   ;;  %s1656_s3 = inlined_call_operand.vmem [shape: f32[1,256], index: 3, kind: input, shape index: {}]   ;;  %s1657_s4 = inlined_call_operand.vmem [shape: f32[1,64], index: 4, kind: input, shape index: {}]   ;;  %s1658_s5 = inlined_call_operand.vmem [shape: f32[64,128], index: 5, kind: input, shape index: {}]   ;;  %s1659_s6 = inlined_call_operand.vmem [shape: f32[1,128], index: 6, kind: input, shape index: {}]   ;;  %s1660_s7 = inlined_call_operand.vmem [shape: f32[8,128], index: 7, kind: output, shape index: {}]  }
   0x1   :  { %v1252_v0 = vld [vmem:[%s1653_s2 + $0x78] sm:$0xff]  ;;  %v1257_v1 = vld [vmem:[%s1653_s2 + $0x70] sm:$0xff]  ;;  %v1262_v2 = vld [vmem:[%s1653_s2 + $0x68] sm:$0xff]  ;;  %143 = vmatprep.mubr.f32.mxu0 %v1206_v3  ;;  %301 = vmatprep.mubr.f32.mxu1 %v1206_v3  ;;  %vm1208_vm2 = vmmov 0  }
   0x2   :  { %253 = vmatprep.subr.mxu1 %v1252_v0  ;;  %v1270_v4 = vld [vmem:[%s1653_s2 + $0x60] sm:$0xff]  ;;  %v41_v5 = vld [vmem:[%s1654_s1 + $0x38] sm:$0xff]  ;;  %v40_v7 = vld [vmem:[%s1654_s1 + $0x30] sm:$0xff]  ;;  %v45_v27 = vshrl.u32 %v44_v26, 7 }
   0x3   :  { %254 = vmatpush1.msra.mxu1 %v1257_v1  ;;  %103 = vmatprep.subr.mxu0 %v41_v5  ;;  %v1279_v6 = vld [vmem:[%s1653_s2 + $0x58] sm:$0xff]  ;;  %v39_v8 = vld [vmem:[%s1654_s1 + $0x28] sm:$0xff]  ;;  %v1291_v9 = vld [vmem:[%s1653_s2 + $0x50] sm:$0xff] }
   0x4   :  { %255 = vmatprep.subr.mxu1 %v1262_v2  ;;  %104 = vmatpush1.msra.mxu0 %v40_v7  ;;  %v38_v10 = vld [vmem:[%s1654_s1 + $0x20] sm:$0xff]  ;;  %v1300_v11 = vld [vmem:[%s1653_s2 + $0x48] sm:$0xff]  ;;  %v37_v12 = vld [vmem:[%s1654_s1 + $0x18] sm:$0xff]  ;;  %v46_v28 = vsub.s32 0, %v45_v27  ;;  %v50_v38 = vsub.s32 1, %v45_v27 }
   0x5   :  { %256 = vmatpush1.msra.mxu1 %v1270_v4  ;;  %105 = vmatprep.subr.mxu0 %v39_v8  ;;  %v36_v13 = vld [vmem:[%s1654_s1 + $0x10] sm:$0xff]  ;;  %v1312_v14 = vld [vmem:[%s1653_s2 + $0x40] sm:$0xff]  ;;  %v35_v15 = vld [vmem:[%s1654_s1 + $0x8] sm:$0xff] }
   0x6   :  { %257 = vmatprep.subr.mxu1 %v1279_v6  ;;  %106 = vmatpush1.msra.mxu0 %v38_v10  ;;  %v1321_v16 = vld [vmem:[%s1653_s2 + $0x38] sm:$0xff]  ;;  %v34_v17 = vld [vmem:[%s1654_s1] sm:$0xff]  ;;  %v1330_v18 = vld [vmem:[%s1653_s2 + $0x30] sm:$0xff] }
   0x7   :  { %258 = vmatpush1.msra.mxu1 %v1291_v9  ;;  %107 = vmatprep.subr.mxu0 %v37_v12  ;;  %v26_v19 = vld [vmem:[%s1655_s0] sm:$0xff]  ;;  %v1339_v20 = vld [vmem:[%s1653_s2 + $0x28] sm:$0xff]  ;;  %v1352_v22 = vld [vmem:[%s1653_s2 + $0x18] sm:$0xff] }
   0x8   :  { %259 = vmatprep.subr.mxu1 %v1300_v11  ;;  %108 = vmatpush1.msra.mxu0 %v36_v13  ;;  %v1345_v21 = vld [vmem:[%s1653_s2 + $0x20] sm:$0xff]  ;;  %v1358_v23 = vld [vmem:[%s1653_s2 + $0x10] sm:$0xff]  ;;  %v1365_v24 = vld [vmem:[%s1653_s2 + $0x8] sm:$0xff] }
   0x9   :  { %260 = vmatpush1.msra.mxu1 %v1312_v14  ;;  %109 = vmatprep.subr.mxu0 %v35_v15  ;;  %v1372_v25 = vld [vmem:[%s1653_s2] sm:$0xff]  ;;  %v27_v48 = vld [vmem:[%s1655_s0 + $0x8] sm:$0xff]  ;;  %v28_v15 = vld [vmem:[%s1655_s0 + $0x10] sm:$0xff] }
   0xa   :  { %261 = vmatprep.subr.mxu1 %v1321_v16  ;;  %110 = vmatpush1.msra.mxu0 %v34_v17  ;;  %v42_v29 = vld [vmem:[%s1656_s3] sm:$0x3]  ;;  %v29_v17 = vld [vmem:[%s1655_s0 + $0x18] sm:$0xff]  ;;  %v31_v27 = vld [vmem:[%s1655_s0 + $0x28] sm:$0xff] }
   0xb   :  { %262 = vmatpush1.msra.mxu1 %v1330_v18  ;;  %1101 = vmatmul.mubr.msk.f32.vlgmr.msra.gmra.mxu0 %vm54_vm0, %v26_v19  ;;  %v1415_v30 = vrot.slane %v42_v29, %v46_v28  ;;  %v1421_v39 = vld [vmem:[%s1657_s4] ss:$0 sm:$0xff]  ;;  %v1423_v41 = vrot.slane %v42_v29, %v50_v38  ;;  %s1207_s4 = smov 64   ;;  %v32_v28 = vld [vmem:[%s1655_s0 + $0x30] sm:$0xff]  ;;  %v33_v29 = vld [vmem:[%s1655_s0 + $0x38] sm:$0xff] }
   0xc   :  { %263 = vmatprep.subr.mxu1 %v1339_v20  ;;  %149 = vmatprep.mubr.f32.mxu0 %v1206_v3  ;;  %v30_v19 = vld [vmem:[%s1655_s0 + $0x20] sm:$0xff] }
   0xd   :  { %264 = vmatpush1.msra.mxu1 %v1345_v21  ;;  %447 = vmatprep.subr.mxu0 %v1252_v0 }
   0xe   :  { %265 = vmatprep.subr.mxu1 %v1352_v22  ;;  %448 = vmatpush1.msra.mxu0 %v1257_v1 }
   0xf   :  { %266 = vmatpush1.msra.mxu1 %v1358_v23  ;;  %449 = vmatprep.subr.mxu0 %v1262_v2 }
  0x10   :  { %267 = vmatprep.subr.mxu1 %v1365_v24  ;;  %450 = vmatpush1.msra.mxu0 %v1270_v4 }
  0x11   :  { %268 = vmatpush1.msra.mxu1 %v1372_v25  ;;  %451 = vmatprep.subr.mxu0 %v1279_v6 }
  0x12   :  { %302 = vmatmul.mubr.f32.vlgmr.msra.gmra.mxu1 %v1206_v3  ;;  %350 = vmatprep.subr.mxu1 %v1252_v0 }
  0x13   :  { %351 = vmatpush1.msra.mxu1 %v1257_v1  ;;  %398 = vmatprep.mubr.f32.mxu1 %v1206_v3 }
  0x14   :  { %352 = vmatprep.subr.mxu1 %v1262_v2  ;;  %452 = vmatpush1.msra.mxu0 %v1291_v9 }
  0x15   :  { %353 = vmatpush1.msra.mxu1 %v1270_v4  ;;  %453 = vmatprep.subr.mxu0 %v1300_v11 }
  0x16   :  { %354 = vmatprep.subr.mxu1 %v1279_v6  ;;  %454 = vmatpush1.msra.mxu0 %v1312_v14 }
  0x17   :  { %355 = vmatpush1.msra.mxu1 %v1291_v9  ;;  %455 = vmatprep.subr.mxu0 %v1321_v16 }
  0x18   :  { %356 = vmatprep.subr.mxu1 %v1300_v11  ;;  %456 = vmatpush1.msra.mxu0 %v1330_v18 }
  0x19   :  { %357 = vmatpush1.msra.mxu1 %v1312_v14  ;;  %457 = vmatprep.subr.mxu0 %v1339_v20 }
  0x1a   :  { %358 = vmatprep.subr.mxu1 %v1321_v16  ;;  %458 = vmatpush1.msra.mxu0 %v1345_v21 }
  0x1b   :  { %359 = vmatpush1.msra.mxu1 %v1330_v18  ;;  %459 = vmatprep.subr.mxu0 %v1352_v22 }
  0x1c   :  { %360 = vmatprep.subr.mxu1 %v1339_v20  ;;  %460 = vmatpush1.msra.mxu0 %v1358_v23 }
  0x1d   :  { %361 = vmatpush1.msra.mxu1 %v1345_v21  ;;  %461 = vmatprep.subr.mxu0 %v1365_v24 }
  0x1e   :  { %362 = vmatprep.subr.mxu1 %v1352_v22  ;;  %462 = vmatpush1.msra.mxu0 %v1372_v25 }
  0x1f   :  { %363 = vmatpush1.msra.mxu1 %v1358_v23  ;;  %641 = vmatprep.subr.mxu0 %v1252_v0 }
  0x20   :  { %364 = vmatprep.subr.mxu1 %v1365_v24  ;;  %1102 = vmatmul.mubr.msk.f32.gmra.mxu0 %vm54_vm0, %v27_v48 }
  0x21   :  { %365 = vmatpush1.msra.mxu1 %v1372_v25  ;;  %155 = vmatprep.mubr.f32.mxu0 %v1206_v3 }
  0x22   :  { %544 = vmatprep.subr.mxu1 %v1252_v0 }
  0x24   :  { %1103 = vmatmul.mubr.msk.f32.gmra.mxu0 %vm54_vm0, %v28_v15 }
  0x25   :  { %161 = vmatprep.mubr.f32.mxu0 %v1206_v3 }
  0x28   :  { %1104 = vmatmul.mubr.msk.f32.gmra.mxu0 %vm54_vm0, %v29_v17 }
  0x29   :  { %167 = vmatprep.mubr.f32.mxu0 %v1206_v3 }
  0x2c   :  { %1105 = vmatmul.mubr.msk.f32.gmra.mxu0 %vm54_vm0, %v30_v19 }
  0x2d   :  { %173 = vmatprep.mubr.f32.mxu0 %v1206_v3 }
  0x30   :  { %1106 = vmatmul.mubr.msk.f32.gmra.mxu0 %vm54_vm0, %v31_v27 }
  0x31   :  { %179 = vmatprep.mubr.f32.mxu0 %v1206_v3 }
  0x34   :  { %1107 = vmatmul.mubr.msk.f32.gmra.mxu0 %vm54_vm0, %v32_v28 }
  0x35   :  { %185 = vmatprep.mubr.f32.mxu0 %v1206_v3 }
  0x38   :  { %1108 = vmatmul.mubr.msk.f32.gmra.mxu0 %vm54_vm0, %v33_v29 }
  0x39   :  { %495 = vmatprep.mubr.f32.mxu0 %v1206_v3 }
  0xcb   :  { %v145_v31 = vpop.f32.mrf.mxu0 }
  0xcc   :  { %v146_v32 = vadd.f32 %v145_v31, %v1415_v30 }
  0xcd   :  { %v147_v42 = vpop.f32.mrf.mxu0 }
  0xce   :  { %v148_v45 = vadd.f32 %v147_v42, %v1423_v41 }
  0xd2   :  { %v303_v33 = vpop.f32.mrf.mxu1 }
  0xd3   :  { %v308_v34 = vadd.f32 %v303_v33, %v146_v32 }
  0xd4   :  { %v305_v40 = vpop.f32.mrf.mxu1 }
  0xd5   :  { %v1110_v35 = vmul.f32 -1.442695, %v308_v34  ;;  %v315_v43 = vadd.f32 %v1421_v39, %v305_v40 }
  0xd7   :  { %1158 = vpow2.f32 %v1110_v35 }
  0xe0   :  { %v151_v56 = vpop.f32.mrf.mxu0 }
  0xe1   :  { %v152_v57 = vadd.f32 %v151_v56, %v1415_v30 }
  0xe2   :  { %v153_v5 = vpop.f32.mrf.mxu0 }
  0xe3   :  { %v154_v10 = vadd.f32 %v153_v5, %v1423_v41 }
  0xe4   :  { %v1159_v36 = vpop.eup %1158 }
  0xe5   :  { %v312_v37 = vadd.f32 1.0, %v1159_v36 }
  0xe7   :  { %1160 = vrcp.f32 %v312_v37  ;;  %v157_v37 = vpop.f32.mrf.mxu0 }
  0xe9   :  { %v159_v38 = vpop.f32.mrf.mxu0 }
  0xeb   :  { %v163_v40 = vpop.f32.mrf.mxu0 }
  0xec   :  { %v164_v15 = vadd.f32 %v163_v40, %v1415_v30 }
  0xed   :  { %v165_v42 = vpop.f32.mrf.mxu0 }
  0xf4   :  { %v1161_v44 = vpop.eup %1160 }
  0xf5   :  { %v316_v46 = vmul.f32 %v1161_v44, %v315_v43  ;;  %v319_v50 = vsub.f32 1.0, %v1161_v44  ;;  %v325_v52 = vmul.f32 0.0, %v1161_v44  ;;  %v1505_v43 = vpop.f32.mrf.mxu0 }
  0xf7   :  { %v317_v47 = vadd.f32 %v316_v46, %v148_v45  ;;  %v1507_v44 = vpop.f32.mrf.mxu0 }
  0xf9   :  { %1162 = vtanh.f32 %v317_v47  ;;  %v1509_v45 = vpop.f32.mrf.mxu0 }
  0xfb   :  { %v1511_v46 = vpop.f32.mrf.mxu0 }
  0xfd   :  { %v1513_v47 = vpop.f32.mrf.mxu0 }
  0xff   :  { %v1515_v48 = vpop.f32.mrf.mxu0 }
 0x106   :  { %v1163_v49 = vpop.eup %1162 }
 0x107   :  { %321 = vrot.lane.b32.xlu0 %v1163_v49, %s1207_s4  ;;  %v1517_v49 = vpop.f32.mrf.mxu0 }
 0x179   :  { %v322_v51 = vpop.permute.xlu0 %321 }
 0x17a   :  { %v324_v53 = vmul.f32 %v322_v51, %v319_v50  ;;  %v1519_v50 = vpop.f32.mrf.mxu0  ;;  %v158_v51 = vadd.f32 %v157_v37, %v1415_v30 }
 0x17c   :  { %v326_v54 = vadd.f32 %v325_v52, %v324_v53 }
 0x17e   :  { %330 = vrot.lane.b32.xlu0 %v326_v54, %s1207_s4 }
 0x1f0   :  { %v331_v55 = vpop.permute.xlu0 %330 }
 0x1f1   :  { %1111 = vmatmul.mubr.msk.f32.vlgmr.msra.gmra.mxu1 %vm233_vm1, %v331_v55 }
 0x1f2   :  { %545 = vmatpush1.msra.mxu1 %v1257_v1  ;;  %592 = vmatprep.mubr.f32.mxu1 %v1206_v3 }
 0x1f3   :  { %546 = vmatprep.subr.mxu1 %v1262_v2 }
 0x1f4   :  { %547 = vmatpush1.msra.mxu1 %v1270_v4 }
 0x1f5   :  { %548 = vmatprep.subr.mxu1 %v1279_v6 }
 0x1f6   :  { %549 = vmatpush1.msra.mxu1 %v1291_v9 }
 0x1f7   :  { %550 = vmatprep.subr.mxu1 %v1300_v11 }
 0x1f8   :  { %551 = vmatpush1.msra.mxu1 %v1312_v14 }
 0x1f9   :  { %552 = vmatprep.subr.mxu1 %v1321_v16 }
 0x1fa   :  { %553 = vmatpush1.msra.mxu1 %v1330_v18 }
 0x1fb   :  { %554 = vmatprep.subr.mxu1 %v1339_v20 }
 0x1fc   :  { %555 = vmatpush1.msra.mxu1 %v1345_v21 }
 0x1fd   :  { %556 = vmatprep.subr.mxu1 %v1352_v22 }
 0x1fe   :  { %557 = vmatpush1.msra.mxu1 %v1358_v23 }
 0x1ff   :  { %558 = vmatprep.subr.mxu1 %v1365_v24 }
 0x200   :  { %559 = vmatpush1.msra.mxu1 %v1372_v25 }
 0x201   :  { %738 = vmatprep.subr.mxu1 %v1252_v0 }
 0x2b1   :  { %v400_v58 = vpop.f32.mrf.mxu1 }
 0x2b2   :  { %v405_v59 = vadd.f32 %v400_v58, %v152_v57 }
 0x2b3   :  { %v402_v63 = vpop.f32.mrf.mxu1 }
 0x2b4   :  { %v1112_v60 = vmul.f32 -1.442695, %v405_v59  ;;  %v412_v7 = vadd.f32 %v1421_v39, %v402_v63 }
 0x2b6   :  { %1164 = vpow2.f32 %v1112_v60  ;;  %v160_v60 = vadd.f32 %v159_v38, %v1423_v41 }
 0x2c3   :  { %v1165_v61 = vpop.eup %1164 }
 0x2c4   :  { %v409_v62 = vadd.f32 1.0, %v1165_v61 }
 0x2c6   :  { %1166 = vrcp.f32 %v409_v62 }
 0x2d3   :  { %v1167_v8 = vpop.eup %1166 }
 0x2d4   :  { %v413_v12 = vmul.f32 %v1167_v8, %v412_v7  ;;  %v416_v31 = vsub.f32 1.0, %v1167_v8  ;;  %v422_v33 = vmul.f32 %v1167_v8, %v326_v54 }
 0x2d6   :  { %v414_v13 = vadd.f32 %v413_v12, %v154_v10 }
 0x2d8   :  { %1168 = vtanh.f32 %v414_v13 }
 0x2e5   :  { %v1169_v26 = vpop.eup %1168 }
 0x2e6   :  { %418 = vrot.lane.b32.xlu1 %v1169_v26, %s1207_s4 }
 0x358   :  { %v419_v32 = vpop.permute.xlu1 %418 }
 0x359   :  { %v421_v34 = vmul.f32 %v419_v32, %v416_v31 }
 0x35b   :  { %v423_v35 = vadd.f32 %v422_v33, %v421_v34  ;;  %v166_v33 = vadd.f32 %v165_v42, %v1423_v41  ;;  %v170_v42 = vadd.f32 %v1505_v43, %v1415_v30 }
 0x35d   :  { %427 = vrot.lane.b32.xlu1 %v423_v35, %s1207_s4 }
 0x3cf   :  { %v428_v36 = vpop.permute.xlu1 %427 }
 0x3d0   :  { %1113 = vmatmul.mubr.msk.f32.vlgmr.msra.gmra.mxu0 %vm233_vm1, %v428_v36 }
 0x3d1   :  { %642 = vmatpush1.msra.mxu0 %v1257_v1  ;;  %689 = vmatprep.mubr.f32.mxu0 %v1206_v3 }
 0x3d2   :  { %643 = vmatprep.subr.mxu0 %v1262_v2 }
 0x3d3   :  { %644 = vmatpush1.msra.mxu0 %v1270_v4 }
 0x3d4   :  { %645 = vmatprep.subr.mxu0 %v1279_v6 }
 0x3d5   :  { %646 = vmatpush1.msra.mxu0 %v1291_v9 }
 0x3d6   :  { %647 = vmatprep.subr.mxu0 %v1300_v11 }
 0x3d7   :  { %648 = vmatpush1.msra.mxu0 %v1312_v14 }
 0x3d8   :  { %649 = vmatprep.subr.mxu0 %v1321_v16 }
 0x3d9   :  { %650 = vmatpush1.msra.mxu0 %v1330_v18 }
 0x3da   :  { %651 = vmatprep.subr.mxu0 %v1339_v20 }
 0x3db   :  { %652 = vmatpush1.msra.mxu0 %v1345_v21 }
 0x3dc   :  { %653 = vmatprep.subr.mxu0 %v1352_v22 }
 0x3dd   :  { %654 = vmatpush1.msra.mxu0 %v1358_v23 }
 0x3de   :  { %655 = vmatprep.subr.mxu0 %v1365_v24 }
 0x3df   :  { %656 = vmatpush1.msra.mxu0 %v1372_v25 }
 0x3e0   :  { %835 = vmatprep.subr.mxu0 %v1252_v0 }
 0x490   :  { %v497_v52 = vpop.f32.mrf.mxu0 }
 0x491   :  { %v502_v53 = vadd.f32 %v497_v52, %v158_v51 }
 0x492   :  { %v499_v57 = vpop.f32.mrf.mxu0 }
 0x493   :  { %v1114_v54 = vmul.f32 -1.442695, %v502_v53  ;;  %v509_v58 = vadd.f32 %v1421_v39, %v499_v57 }
 0x495   :  { %1170 = vpow2.f32 %v1114_v54 }
 0x4a2   :  { %v1171_v55 = vpop.eup %1170 }
 0x4a3   :  { %v506_v56 = vadd.f32 1.0, %v1171_v55 }
 0x4a5   :  { %1172 = vrcp.f32 %v506_v56 }
 0x4b2   :  { %v1173_v59 = vpop.eup %1172 }
 0x4b3   :  { %v510_v61 = vmul.f32 %v1173_v59, %v509_v58  ;;  %v513_v5 = vsub.f32 1.0, %v1173_v59  ;;  %v519_v8 = vmul.f32 %v1173_v59, %v423_v35 }
 0x4b5   :  { %v511_v62 = vadd.f32 %v510_v61, %v160_v60  ;;  %v172_v61 = vadd.f32 %v1507_v44, %v1423_v41 }
 0x4b7   :  { %1174 = vtanh.f32 %v511_v62 }
 0x4c4   :  { %v1175_v63 = vpop.eup %1174 }
 0x4c5   :  { %515 = vrot.lane.b32.xlu0 %v1175_v63, %s1207_s4 }
 0x537   :  { %v516_v7 = vpop.permute.xlu0 %515 }
 0x538   :  { %v518_v10 = vmul.f32 %v516_v7, %v513_v5 }
 0x53a   :  { %v520_v12 = vadd.f32 %v519_v8, %v518_v10 }
 0x53c   :  { %524 = vrot.lane.b32.xlu1 %v520_v12, %s1207_s4 }
 0x5ae   :  { %v525_v13 = vpop.permute.xlu1 %524 }
 0x5af   :  { %1115 = vmatmul.mubr.msk.f32.vlgmr.msra.gmra.mxu1 %vm233_vm1, %v525_v13 }
 0x5b0   :  { %739 = vmatpush1.msra.mxu1 %v1257_v1  ;;  %786 = vmatprep.mubr.f32.mxu1 %v1206_v3 }
 0x5b1   :  { %740 = vmatprep.subr.mxu1 %v1262_v2 }
 0x5b2   :  { %741 = vmatpush1.msra.mxu1 %v1270_v4 }
 0x5b3   :  { %742 = vmatprep.subr.mxu1 %v1279_v6 }
 0x5b4   :  { %743 = vmatpush1.msra.mxu1 %v1291_v9 }
 0x5b5   :  { %744 = vmatprep.subr.mxu1 %v1300_v11 }
 0x5b6   :  { %745 = vmatpush1.msra.mxu1 %v1312_v14 }
 0x5b7   :  { %746 = vmatprep.subr.mxu1 %v1321_v16 }
 0x5b8   :  { %747 = vmatpush1.msra.mxu1 %v1330_v18 }
 0x5b9   :  { %748 = vmatprep.subr.mxu1 %v1339_v20 }
 0x5ba   :  { %749 = vmatpush1.msra.mxu1 %v1345_v21 }
 0x5bb   :  { %750 = vmatprep.subr.mxu1 %v1352_v22 }
 0x5bc   :  { %751 = vmatpush1.msra.mxu1 %v1358_v23 }
 0x5bd   :  { %752 = vmatprep.subr.mxu1 %v1365_v24 }
 0x5be   :  { %753 = vmatpush1.msra.mxu1 %v1372_v25 }
 0x5bf   :  { %932 = vmatprep.subr.mxu1 %v1252_v0 }
 0x66f   :  { %v594_v17 = vpop.f32.mrf.mxu1 }
 0x670   :  { %v599_v19 = vadd.f32 %v594_v17, %v164_v15 }
 0x671   :  { %v596_v29 = vpop.f32.mrf.mxu1 }
 0x672   :  { %v1116_v26 = vmul.f32 -1.442695, %v599_v19  ;;  %v606_v31 = vadd.f32 %v1421_v39, %v596_v29  ;;  %v182_v19 = vadd.f32 %v1513_v47, %v1415_v30 }
 0x674   :  { %1176 = vpow2.f32 %v1116_v26 }
 0x681   :  { %v1177_v27 = vpop.eup %1176 }
 0x682   :  { %v603_v28 = vadd.f32 1.0, %v1177_v27 }
 0x684   :  { %1178 = vrcp.f32 %v603_v28 }
 0x691   :  { %v1179_v32 = vpop.eup %1178 }
 0x692   :  { %v607_v34 = vmul.f32 %v1179_v32, %v606_v31  ;;  %v610_v0 = vsub.f32 1.0, %v1179_v32  ;;  %v616_v38 = vmul.f32 %v1179_v32, %v520_v12 }
 0x694   :  { %v608_v35 = vadd.f32 %v607_v34, %v166_v33  ;;  %v184_v34 = vadd.f32 %v1515_v48, %v1423_v41 }
 0x696   :  { %1180 = vtanh.f32 %v608_v35 }
 0x6a3   :  { %v1181_v36 = vpop.eup %1180 }
 0x6a4   :  { %612 = vrot.lane.b32.xlu0 %v1181_v36, %s1207_s4 }
 0x716   :  { %v613_v37 = vpop.permute.xlu0 %612 }
 0x717   :  { %v615_v40 = vmul.f32 %v613_v37, %v610_v0 }
 0x719   :  { %v617_v51 = vadd.f32 %v616_v38, %v615_v40 }
 0x71b   :  { %621 = vrot.lane.b32.xlu1 %v617_v51, %s1207_s4 }
 0x78d   :  { %v622_v52 = vpop.permute.xlu1 %621 }
 0x78e   :  { %1117 = vmatmul.mubr.msk.f32.vlgmr.msra.gmra.mxu0 %vm233_vm1, %v622_v52 }
 0x78f   :  { %836 = vmatpush1.msra.mxu0 %v1257_v1  ;;  %883 = vmatprep.mubr.f32.mxu0 %v1206_v3 }
 0x790   :  { %837 = vmatprep.subr.mxu0 %v1262_v2 }
 0x791   :  { %838 = vmatpush1.msra.mxu0 %v1270_v4 }
 0x792   :  { %839 = vmatprep.subr.mxu0 %v1279_v6 }
 0x793   :  { %840 = vmatpush1.msra.mxu0 %v1291_v9 }
 0x794   :  { %841 = vmatprep.subr.mxu0 %v1300_v11 }
 0x795   :  { %842 = vmatpush1.msra.mxu0 %v1312_v14 }
 0x796   :  { %843 = vmatprep.subr.mxu0 %v1321_v16 }
 0x797   :  { %844 = vmatpush1.msra.mxu0 %v1330_v18 }
 0x798   :  { %845 = vmatprep.subr.mxu0 %v1339_v20 }
 0x799   :  { %846 = vmatpush1.msra.mxu0 %v1345_v21 }
 0x79a   :  { %847 = vmatprep.subr.mxu0 %v1352_v22 }
 0x79b   :  { %848 = vmatpush1.msra.mxu0 %v1358_v23 }
 0x79c   :  { %849 = vmatprep.subr.mxu0 %v1365_v24 }
 0x79d   :  { %850 = vmatpush1.msra.mxu0 %v1372_v25 }
 0x79e   :  { %1136 = vmatprep.subr.mxu0 %v1206_v3 }
 0x84e   :  { %v691_v53 = vpop.f32.mrf.mxu0 }
 0x84f   :  { %v696_v54 = vadd.f32 %v691_v53, %v170_v42  ;;  %v188_v42 = vadd.f32 %v1517_v49, %v1415_v30  ;;  %v1012_v49 = vld [vmem:[%s1658_s5 + $0x30] sm:$0xff] }
 0x850   :  { %v693_v58 = vpop.f32.mrf.mxu0 }
 0x851   :  { %v1118_v55 = vmul.f32 -1.442695, %v696_v54  ;;  %v703_v59 = vadd.f32 %v1421_v39, %v693_v58 }
 0x853   :  { %1182 = vpow2.f32 %v1118_v55 }
 0x860   :  { %v1183_v56 = vpop.eup %1182 }
 0x861   :  { %v700_v57 = vadd.f32 1.0, %v1183_v56 }
 0x863   :  { %1184 = vrcp.f32 %v700_v57 }
 0x870   :  { %v1185_v60 = vpop.eup %1184 }
 0x871   :  { %v704_v62 = vmul.f32 %v1185_v60, %v703_v59  ;;  %v707_v43 = vsub.f32 1.0, %v1185_v60  ;;  %v713_v8 = vmul.f32 %v1185_v60, %v617_v51  ;;  %v190_v60 = vadd.f32 %v1519_v50, %v1423_v41  ;;  %v1009_v50 = vld [vmem:[%s1658_s5 + $0x18] sm:$0xff] }
 0x873   :  { %v705_v63 = vadd.f32 %v704_v62, %v172_v61 }
 0x875   :  { %1186 = vtanh.f32 %v705_v63 }
 0x882   :  { %v1187_v5 = vpop.eup %1186 }
 0x883   :  { %709 = vrot.lane.b32.xlu0 %v1187_v5, %s1207_s4  ;;  %v1008_v5 = vld [vmem:[%s1658_s5 + $0x10] sm:$0xff] }
 0x8f5   :  { %v710_v7 = vpop.permute.xlu0 %709 }
 0x8f6   :  { %v712_v10 = vmul.f32 %v710_v7, %v707_v43  ;;  %v1007_v43 = vld [vmem:[%s1658_s5 + $0x8] sm:$0xff]  ;;  %v1006_v7 = vld [vmem:[%s1658_s5] sm:$0xff] }
 0x8f8   :  { %v714_v12 = vadd.f32 %v713_v8, %v712_v10 }
 0x8fa   :  { %718 = vrot.lane.b32.xlu1 %v714_v12, %s1207_s4 }
 0x96c   :  { %v719_v13 = vpop.permute.xlu1 %718 }
 0x96d   :  { %1119 = vmatmul.mubr.msk.f32.vlgmr.msra.gmra.mxu1 %vm233_vm1, %v719_v13 }
 0x96e   :  { %933 = vmatpush1.msra.mxu1 %v1257_v1  ;;  %980 = vmatprep.mubr.f32.mxu1 %v1206_v3  ;;  %v176_v1 = vadd.f32 %v1509_v45, %v1415_v30  ;;  %v1013_v30 = vld [vmem:[%s1658_s5 + $0x38] sm:$0xff] }
 0x96f   :  { %934 = vmatprep.subr.mxu1 %v1262_v2 }
 0x970   :  { %935 = vmatpush1.msra.mxu1 %v1270_v4 }
 0x971   :  { %936 = vmatprep.subr.mxu1 %v1279_v6 }
 0x972   :  { %937 = vmatpush1.msra.mxu1 %v1291_v9 }
 0x973   :  { %938 = vmatprep.subr.mxu1 %v1300_v11 }
 0x974   :  { %939 = vmatpush1.msra.mxu1 %v1312_v14 }
 0x975   :  { %940 = vmatprep.subr.mxu1 %v1321_v16 }
 0x976   :  { %941 = vmatpush1.msra.mxu1 %v1330_v18 }
 0x977   :  { %942 = vmatprep.subr.mxu1 %v1339_v20  ;;  %v178_v20 = vadd.f32 %v1511_v46, %v1423_v41  ;;  %v1010_v41 = vld [vmem:[%s1658_s5 + $0x20] sm:$0xff] }
 0x978   :  { %943 = vmatpush1.msra.mxu1 %v1345_v21 }
 0x979   :  { %944 = vmatprep.subr.mxu1 %v1352_v22 }
 0x97a   :  { %945 = vmatpush1.msra.mxu1 %v1358_v23 }
 0x97b   :  { %946 = vmatprep.subr.mxu1 %v1365_v24 }
 0x97c   :  { %947 = vmatpush1.msra.mxu1 %v1372_v25 }
 0xa2d   :  { %v788_v2 = vpop.f32.mrf.mxu1 }
 0xa2e   :  { %v793_v4 = vadd.f32 %v788_v2, %v176_v1 }
 0xa2f   :  { %v790_v14 = vpop.f32.mrf.mxu1 }
 0xa30   :  { %v1120_v6 = vmul.f32 -1.442695, %v793_v4  ;;  %v800_v16 = vadd.f32 %v1421_v39, %v790_v14  ;;  %v1125_v4 = vld [vmem:[%s1659_s6] ss:$0 sm:$0xff] }
 0xa32   :  { %1188 = vpow2.f32 %v1120_v6 }
 0xa3f   :  { %v1189_v9 = vpop.eup %1188 }
 0xa40   :  { %v797_v11 = vadd.f32 1.0, %v1189_v9 }
 0xa42   :  { %1190 = vrcp.f32 %v797_v11 }
 0xa4f   :  { %v1191_v18 = vpop.eup %1190 }
 0xa50   :  { %v801_v21 = vmul.f32 %v1191_v18, %v800_v16  ;;  %v804_v24 = vsub.f32 1.0, %v1191_v18  ;;  %v810_v44 = vmul.f32 %v1191_v18, %v714_v12 }
 0xa52   :  { %v802_v22 = vadd.f32 %v801_v21, %v178_v20 }
 0xa54   :  { %1192 = vtanh.f32 %v802_v22 }
 0xa61   :  { %v1193_v23 = vpop.eup %1192 }
 0xa62   :  { %806 = vrot.lane.b32.xlu0 %v1193_v23, %s1207_s4 }
 0xad4   :  { %v807_v25 = vpop.permute.xlu0 %806 }
 0xad5   :  { %v809_v45 = vmul.f32 %v807_v25, %v804_v24 }
 0xad7   :  { %v811_v15 = vadd.f32 %v810_v44, %v809_v45 }
 0xad9   :  { %815 = vrot.lane.b32.xlu1 %v811_v15, %s1207_s4 }
 0xb4b   :  { %v816_v17 = vpop.permute.xlu1 %815 }
 0xb4c   :  { %1121 = vmatmul.mubr.msk.f32.vlgmr.msra.gmra.mxu0 %vm233_vm1, %v816_v17 }
 0xb4d   :  { %1152 = vmatprep.mubr.msk.f32.mxu0 %vm1208_vm2, %v1206_v3  ;;  %1137 = vmatpush3.msra.mxu0 %v1013_v30 }
 0xb4e   :  { %1138 = vmatprep.subr.mxu0 %v1206_v3 }
 0xb4f   :  { %1139 = vmatpush3.msra.mxu0 %v1012_v49 }
 0xb50   :  { %1140 = vmatprep.subr.mxu0 %v1206_v3 }
 0xc0c   :  { %v885_v46 = vpop.f32.mrf.mxu0 }
 0xc0d   :  { %v890_v26 = vadd.f32 %v885_v46, %v182_v19 }
 0xc0e   :  { %v887_v31 = vpop.f32.mrf.mxu0 }
 0xc0f   :  { %v1122_v27 = vmul.f32 -1.442695, %v890_v26  ;;  %v897_v32 = vadd.f32 %v1421_v39, %v887_v31 }
 0xc11   :  { %1194 = vpow2.f32 %v1122_v27 }
 0xc1e   :  { %v1195_v28 = vpop.eup %1194 }
 0xc1f   :  { %v894_v29 = vadd.f32 1.0, %v1195_v28 }
 0xc21   :  { %1196 = vrcp.f32 %v894_v29 }
 0xc2e   :  { %v1197_v33 = vpop.eup %1196 }
 0xc2f   :  { %v898_v35 = vmul.f32 %v1197_v33, %v897_v32  ;;  %v901_v47 = vsub.f32 1.0, %v1197_v33  ;;  %v907_v38 = vmul.f32 %v1197_v33, %v811_v15 }
 0xc31   :  { %v899_v36 = vadd.f32 %v898_v35, %v184_v34 }
 0xc33   :  { %1198 = vtanh.f32 %v899_v36 }
 0xc40   :  { %v1199_v0 = vpop.eup %1198 }
 0xc41   :  { %903 = vrot.lane.b32.xlu0 %v1199_v0, %s1207_s4 }
 0xcb3   :  { %v904_v37 = vpop.permute.xlu0 %903 }
 0xcb4   :  { %v906_v40 = vmul.f32 %v904_v37, %v901_v47 }
 0xcb6   :  { %v908_v51 = vadd.f32 %v907_v38, %v906_v40 }
 0xcb8   :  { %912 = vrot.lane.b32.xlu1 %v908_v51, %s1207_s4 }
 0xd2a   :  { %v913_v52 = vpop.permute.xlu1 %912 }
 0xd2b   :  { %1123 = vmatmul.mubr.msk.f32.vlgmr.msra.gmra.mxu1 %vm233_vm1, %v913_v52 }
 0xdeb   :  { %v982_v48 = vpop.f32.mrf.mxu1 }
 0xdec   :  { %v987_v53 = vadd.f32 %v982_v48, %v188_v42 }
 0xded   :  { %v984_v57 = vpop.f32.mrf.mxu1 }
 0xdee   :  { %v1124_v54 = vmul.f32 -1.442695, %v987_v53  ;;  %v994_v58 = vadd.f32 %v1421_v39, %v984_v57  ;;  %v1011_v39 = vld [vmem:[%s1658_s5 + $0x28] sm:$0xff] }
 0xdef   :  { %1141 = vmatpush3.msra.mxu0 %v1011_v39 }
 0xdf0   :  { %1200 = vpow2.f32 %v1124_v54  ;;  %1142 = vmatprep.subr.mxu0 %v1206_v3 }
 0xdf1   :  { %1143 = vmatpush3.msra.mxu0 %v1010_v41 }
 0xdf2   :  { %1144 = vmatprep.subr.mxu0 %v1206_v3 }
 0xdf3   :  { %1145 = vmatpush3.msra.mxu0 %v1009_v50 }
 0xdf4   :  { %1146 = vmatprep.subr.mxu0 %v1206_v3 }
 0xdf5   :  { %1147 = vmatpush3.msra.mxu0 %v1008_v5 }
 0xdf6   :  { %1148 = vmatprep.subr.mxu0 %v1206_v3 }
 0xdf7   :  { %1149 = vmatpush3.msra.mxu0 %v1007_v43 }
 0xdf8   :  { %1150 = vmatprep.subr.mxu0 %v1206_v3 }
 0xdf9   :  { %1151 = vmatpush3.msra.mxu0 %v1006_v7 }
 0xdfd   :  { %v1201_v55 = vpop.eup %1200 }
 0xdfe   :  { %v991_v56 = vadd.f32 1.0, %v1201_v55 }
 0xe00   :  { %1202 = vrcp.f32 %v991_v56 }
 0xe0d   :  { %v1203_v59 = vpop.eup %1202 }
 0xe0e   :  { %v995_v61 = vmul.f32 %v1203_v59, %v994_v58  ;;  %v998_v8 = vsub.f32 1.0, %v1203_v59  ;;  %v1004_v12 = vmul.f32 %v1203_v59, %v908_v51 }
 0xe10   :  { %v996_v62 = vadd.f32 %v995_v61, %v190_v60 }
 0xe12   :  { %1204 = vtanh.f32 %v996_v62 }
 0xe1f   :  { %v1205_v63 = vpop.eup %1204 }
 0xe20   :  { %1000 = vrot.lane.b32.xlu0 %v1205_v63, %s1207_s4 }
 0xe92   :  { %v1001_v10 = vpop.permute.xlu0 %1000 }
 0xe93   :  { %v1003_v13 = vmul.f32 %v1001_v10, %v998_v8 }
 0xe95   :  { %v1005_v1 = vadd.f32 %v1004_v12, %v1003_v13 }
 0xe97   :  { %1022 = vrot.lane.b32.xlu1 %v1005_v1, %s1207_s4 }
 0xf09   :  { %v1023_v2 = vpop.permute.xlu1 %1022 }
 0xf0a   :  { %1153 = vmatmul.mubr.msk.f32.vlgmr.msra.gmra.mxu0 %vm233_vm1, %v1023_v2 }
 0xfca   :  { %v1092_v6 = vpop.f32.mrf.mxu0 }
 0xfcb   :  { %v1093_v9 = vadd.f32 %v1125_v4, %v1092_v6 }
 0xfcc   :  { %v1154_v11 = vpop.f32.mrf.mxu0 }
 0xfcd   :  { %1096 = vst [vmem:[%s1660_s7] sm:$0xff] %v1093_v9 }

</bundles_post_ra>
